<compile_context>
chip_gen: v6e
topology: v6e:2x2x1
jax: 0.10.0
libtpu: 0.0.40
codegen_flags: <defaults>
</compile_context>

<pallas_src>
import functools

import jax
import jax.numpy as jnp
from jax.experimental import pallas as pl
from jax.experimental.pallas import tpu as pltpu


def _round_up(n, m):
    return ((n + m - 1) // m) * m


def _cdiv(a, b):
    return (a + b - 1) // b


def mlp_kernel(x_ref, w1_ref, b1_ref, w2_ref, b2_ref, w3_ref, b3_ref, o_ref):
    """Fused 3-layer MLP; everything VMEM-resident per grid step.

    Matmul inputs use the weights' dtype (bf16 by default), accumulation and
    bias/ReLU are f32.  Only the valid output columns are stored.
    """
    cdt = w1_ref.dtype
    x = x_ref[...].astype(cdt)                                            # (tb, in_dim)
    h1 = jnp.dot(x, w1_ref[...], preferred_element_type=jnp.float32) + b1_ref[...]
    h1 = jnp.maximum(h1, 0.0).astype(cdt)
    h2 = jnp.dot(h1, w2_ref[...], preferred_element_type=jnp.float32) + b2_ref[...]
    h2 = jnp.maximum(h2, 0.0).astype(cdt)
    out = jnp.dot(h2, w3_ref[...], preferred_element_type=jnp.float32) + b3_ref[...]
    # W3/b3 are lane-padded to a multiple of 128 for the MXU; store only the
    # valid columns (o_ref's last dim is the true out_dim).
    o_ref[...] = out[:, : o_ref.shape[-1]].astype(o_ref.dtype)


@functools.partial(jax.jit, static_argnames=("out_dim", "tb"))
def _forward(x, w1, b1, w2, b2, w3, b3, *, out_dim, tb):
    B, in_dim = x.shape
    hidden = w1.shape[1]
    out_pad = w3.shape[1]
    cbytes = jnp.dtype(w1.dtype).itemsize

    # ---- batch tiling: minimize padded rows, keep tiles multiple of 16, and
    # ---- guarantee >= 2 "parallel" grid steps for B >= 32 (v7x megacore). ----
    n_steps = max(1, _cdiv(B, tb))
    if B >= 32:
        n_steps = max(n_steps, 2)
    row_align = 16 if B >= 16 else 8
    tb_eff = _round_up(_cdiv(B, n_steps), row_align)
    b_pad = tb_eff * n_steps

    if b_pad != B:  # rare: single f32 row-pad (no dtype change, no lane pad)
        x = jnp.zeros((b_pad, in_dim), x.dtype).at[:B, :].set(x)

    grid = (n_steps,)

    # ---- honest per-step VMEM estimate (double-buffered I/O + intermediates) ----
    vmem_est = (
        2 * tb_eff * in_dim * 4                  # x tile (f32, double-buffered)
        + 2 * tb_eff * out_dim * 4               # out tile (f32, double-buffered)
        + tb_eff * in_dim * cbytes               # x cast to compute dtype
        + 2 * tb_eff * hidden * 4                # h1 / h2 f32 accumulators
        + 2 * tb_eff * hidden * cbytes           # h1 / h2 compute-dtype copies
        + tb_eff * out_pad * 4                   # pre-slice f32 output
        + 2 * ((in_dim * hidden + hidden * hidden + hidden * out_pad) * cbytes
               + (2 * hidden + out_pad) * 4)     # weights + biases
    )
    vmem_limit = None
    if vmem_est > 12 * 1024 * 1024:
        vmem_limit = min(int(1.5 * vmem_est), 64 * 1024 * 1024)

    const = lambda shape: pl.BlockSpec(shape, lambda i: (0, 0))  # grid-invariant

    out = pl.pallas_call(
        mlp_kernel,
        out_shape=jax.ShapeDtypeStruct((b_pad, out_dim), jnp.float32),
        grid_spec=pltpu.PrefetchScalarGridSpec(
            num_scalar_prefetch=0,
            grid=grid,
            in_specs=[
                pl.BlockSpec((tb_eff, in_dim), lambda i: (i, 0)),   # x tile
                const((in_dim, hidden)),                            # W1
                const((1, hidden)),                                 # b1
                const((hidden, hidden)),                            # W2
                const((1, hidden)),                                 # b2
                const((hidden, out_pad)),                           # W3 (lane-padded)
                const((1, out_pad)),                                # b3 (lane-padded)
            ],
            out_specs=pl.BlockSpec((tb_eff, out_dim), lambda i: (i, 0)),
        ),
        compiler_params=pltpu.CompilerParams(
            dimension_semantics=("parallel",),   # batch axis -> megacore-shardable
            vmem_limit_bytes=vmem_limit,
        ),
    )(x, w1, b1, w2, b2, w3, b3)

    return out if b_pad == B else out[:B]


def prepare_params(params, *, compute_dtype=jnp.bfloat16):
    """One-time conversion of raw f32 params into the kernel's layout.

    Weights are cast to `compute_dtype` (MXU input dtype); W3/b3 are lane-padded
    to a multiple of 128 so the last matmul is full-width; biases stay f32.
    """
    w1, b1, w2, b2, w3, b3 = params
    hidden = w1.shape[1]
    out_dim = w3.shape[1]
    out_pad = _round_up(out_dim, 128)
    f32 = jnp.float32

    w3p = jnp.zeros((hidden, out_pad), compute_dtype).at[:, :out_dim].set(
        w3.astype(compute_dtype))
    b3p = jnp.zeros((1, out_pad), f32).at[:, :out_dim].set(
        b3.astype(f32).reshape(1, -1))

    prepared = (
        w1.astype(compute_dtype), b1.astype(f32).reshape(1, -1),
        w2.astype(compute_dtype), b2.astype(f32).reshape(1, -1),
        w3p, b3p,
    )
    return prepared, int(out_dim)


def continuous_q_network(x, prepared, *, tb=1024):
    """Forward pass of ContinuousQNetwork. x: (B, input_dim) float32."""
    (w1, b1, w2, b2, w3, b3), out_dim = prepared
    return _forward(x, w1, b1, w2, b2, w3, b3, out_dim=out_dim, tb=tb)


def init_params(key, input_dim, output_dim, hidden=256):
    """Init mimicking nn.Linear's U(-1/sqrt(fan_in), 1/sqrt(fan_in)).

    Weights stored (in_features, out_features): x @ W + b == F.linear(x, W.T, b).
    """
    ks = jax.random.split(key, 6)

    def lin(kw, kb, fan_in, fan_out):
        bound = 1.0 / jnp.sqrt(jnp.float32(fan_in))
        w = jax.random.uniform(kw, (fan_in, fan_out), jnp.float32, -bound, bound)
        b = jax.random.uniform(kb, (1, fan_out), jnp.float32, -bound, bound)
        return w, b

    w1, b1 = lin(ks[0], ks[1], input_dim, hidden)
    w2, b2 = lin(ks[2], ks[3], hidden, hidden)
    w3, b3 = lin(ks[4], ks[5], hidden, output_dim)
    return (w1, b1, w2, b2, w3, b3)


def reference_forward(x, params):
    """Pure-f32 reference (PyTorch semantics)."""
    w1, b1, w2, b2, w3, b3 = params
    h1 = jnp.maximum(x @ w1 + b1, 0.0)
    h2 = jnp.maximum(h1 @ w2 + b2, 0.0)
    return h2 @ w3 + b3


def reference_forward_bf16(x, params):
    """Reference matching the kernel's bf16-input / f32-accumulate policy."""
    w1, b1, w2, b2, w3, b3 = params
    bf, f32 = jnp.bfloat16, jnp.float32
    h1 = jnp.maximum(
        jnp.dot(x.astype(bf), w1.astype(bf), preferred_element_type=f32) + b1, 0.0)
    h2 = jnp.maximum(
        jnp.dot(h1.astype(bf), w2.astype(bf), preferred_element_type=f32) + b2, 0.0)
    return jnp.dot(h2.astype(bf), w3.astype(bf), preferred_element_type=f32) + b3


if __name__ == "__main__":
    key = jax.random.PRNGKey(0)
    k_param, k_x1, k_x2 = jax.random.split(key, 3)

    input_dim, output_dim = 32, 8
    params = init_params(k_param, input_dim, output_dim)
    prepared = prepare_params(params)          # one-time weight cast/pad

    # Small batch: single grid step, no padding anywhere.
    x_small = jax.random.normal(k_x1, (8, input_dim), jnp.float32)
    out_small = jax.block_until_ready(continuous_q_network(x_small, prepared))
    assert out_small.shape == (8, output_dim)
    assert jnp.allclose(out_small, reference_forward_bf16(x_small, params),
                        atol=1e-3, rtol=1e-3), "mismatch vs bf16 reference (small)"
    assert jnp.allclose(out_small, reference_forward(x_small, params),
                        atol=5e-2, rtol=5e-2), "mismatch vs f32 reference (small)"

    # Larger batch: two balanced 192-row "parallel" grid steps (v7x two-TC path),
    # no batch padding, valid-column-only output stores.
    x_big = jax.random.normal(k_x2, (384, input_dim), jnp.float32)
    out_big = jax.block_until_ready(continuous_q_network(x_big, prepared))
    assert out_big.shape == (384, output_dim)
    assert jnp.allclose(out_big, reference_forward_bf16(x_big, params),
                        atol=1e-3, rtol=1e-3), "mismatch vs bf16 reference (big)"
    assert jnp.allclose(out_big, reference_forward(x_big, params),
                        atol=5e-2, rtol=5e-2), "mismatch vs f32 reference (big)"

    print("KERNEL_OK")
</pallas_src>

<mosaic_0001>
module attributes {stable_mosaic.version = 11 : i64} {
  func.func @mlp_kernel(%arg0: i32, %arg1: memref<8x32xf32, #tpu.memory_space<vmem>>, %arg2: memref<32x256xbf16, #tpu.memory_space<vmem>>, %arg3: memref<1x256xf32, #tpu.memory_space<vmem>>, %arg4: memref<256x256xbf16, #tpu.memory_space<vmem>>, %arg5: memref<1x256xf32, #tpu.memory_space<vmem>>, %arg6: memref<256x128xbf16, #tpu.memory_space<vmem>>, %arg7: memref<1x128xf32, #tpu.memory_space<vmem>>, %arg8: memref<8x8xf32, #tpu.memory_space<vmem>>) attributes {dimension_semantics = [#tpu.dimension_semantics<parallel>], iteration_bounds = array<i64: 1>, scalar_prefetch = 0 : i64, scratch_operands = 0 : i64, tpu.core_type = #tpu.core_type<tc>, window_params = [{transform_indices = @transform_0, window_bounds = array<i64: 8, 32>}, {pipeline_mode = #tpu.pipeline_mode<synchronous>, transform_indices = @transform_1, window_bounds = array<i64: 32, 256>}, {pipeline_mode = #tpu.pipeline_mode<synchronous>, transform_indices = @transform_2, window_bounds = array<i64: 1, 256>}, {pipeline_mode = #tpu.pipeline_mode<synchronous>, transform_indices = @transform_3, window_bounds = array<i64: 256, 256>}, {pipeline_mode = #tpu.pipeline_mode<synchronous>, transform_indices = @transform_4, window_bounds = array<i64: 1, 256>}, {pipeline_mode = #tpu.pipeline_mode<synchronous>, transform_indices = @transform_5, window_bounds = array<i64: 256, 128>}, {pipeline_mode = #tpu.pipeline_mode<synchronous>, transform_indices = @transform_6, window_bounds = array<i64: 1, 128>}, {transform_indices = @transform_7, window_bounds = array<i64: 8, 8>}]} {
    %c0 = arith.constant 0 : index
    %c0_0 = arith.constant 0 : index
    %0 = vector.load %arg1[%c0, %c0_0] : memref<8x32xf32, #tpu.memory_space<vmem>>, vector<8x32xf32>
    %1 = arith.truncf %0 : vector<8x32xf32> to vector<8x32xbf16>
    %c0_1 = arith.constant 0 : index
    %c0_2 = arith.constant 0 : index
    %2 = vector.load %arg2[%c0_1, %c0_2] : memref<32x256xbf16, #tpu.memory_space<vmem>>, vector<32x256xbf16>
    %cst = arith.constant dense<0.000000e+00> : vector<8x256xf32>
    %3 = tpu.matmul %1, %2, %cst {dimension_numbers = #tpu.dot_dimension_numbers<[1], [0], [0], [1], [0, 0, 1, 1], [], []>} : vector<8x32xbf16>, vector<32x256xbf16>, vector<8x256xf32> -> vector<8x256xf32>
    %c0_3 = arith.constant 0 : index
    %c0_4 = arith.constant 0 : index
    %4 = vector.load %arg3[%c0_3, %c0_4] : memref<1x256xf32, #tpu.memory_space<vmem>>, vector<1x256xf32>
    %5 = vector.broadcast %4 : vector<1x256xf32> to vector<8x256xf32>
    %6 = arith.addf %3, %5 : vector<8x256xf32>
    %cst_5 = arith.constant 0.000000e+00 : f32
    %7 = vector.broadcast %cst_5 : f32 to vector<8x256xf32>
    %8 = arith.maximumf %6, %7 : vector<8x256xf32>
    %9 = arith.truncf %8 : vector<8x256xf32> to vector<8x256xbf16>
    %c0_6 = arith.constant 0 : index
    %c0_7 = arith.constant 0 : index
    %10 = vector.load %arg4[%c0_6, %c0_7] : memref<256x256xbf16, #tpu.memory_space<vmem>>, vector<256x256xbf16>
    %cst_8 = arith.constant dense<0.000000e+00> : vector<8x256xf32>
    %11 = tpu.matmul %9, %10, %cst_8 {dimension_numbers = #tpu.dot_dimension_numbers<[1], [0], [0], [1], [0, 0, 1, 1], [], []>} : vector<8x256xbf16>, vector<256x256xbf16>, vector<8x256xf32> -> vector<8x256xf32>
    %c0_9 = arith.constant 0 : index
    %c0_10 = arith.constant 0 : index
    %12 = vector.load %arg5[%c0_9, %c0_10] : memref<1x256xf32, #tpu.memory_space<vmem>>, vector<1x256xf32>
    %13 = vector.broadcast %12 : vector<1x256xf32> to vector<8x256xf32>
    %14 = arith.addf %11, %13 : vector<8x256xf32>
    %cst_11 = arith.constant 0.000000e+00 : f32
    %15 = vector.broadcast %cst_11 : f32 to vector<8x256xf32>
    %16 = arith.maximumf %14, %15 : vector<8x256xf32>
    %17 = arith.truncf %16 : vector<8x256xf32> to vector<8x256xbf16>
    %c0_12 = arith.constant 0 : index
    %c0_13 = arith.constant 0 : index
    %18 = vector.load %arg6[%c0_12, %c0_13] : memref<256x128xbf16, #tpu.memory_space<vmem>>, vector<256x128xbf16>
    %cst_14 = arith.constant dense<0.000000e+00> : vector<8x128xf32>
    %19 = tpu.matmul %17, %18, %cst_14 {dimension_numbers = #tpu.dot_dimension_numbers<[1], [0], [0], [1], [0, 0, 1, 1], [], []>} : vector<8x256xbf16>, vector<256x128xbf16>, vector<8x128xf32> -> vector<8x128xf32>
    %c0_15 = arith.constant 0 : index
    %c0_16 = arith.constant 0 : index
    %20 = vector.load %arg7[%c0_15, %c0_16] : memref<1x128xf32, #tpu.memory_space<vmem>>, vector<1x128xf32>
    %21 = vector.broadcast %20 : vector<1x128xf32> to vector<8x128xf32>
    %22 = arith.addf %19, %21 : vector<8x128xf32>
    %23 = vector.extract_strided_slice %22 {offsets = [0, 0], sizes = [8, 8], strides = [1, 1]} : vector<8x128xf32> to vector<8x8xf32>
    %c0_17 = arith.constant 0 : index
    %c0_18 = arith.constant 0 : index
    %24 = vector.load %arg8[%c0_17, %c0_18] : memref<8x8xf32, #tpu.memory_space<vmem>>, vector<8x8xf32>
    tpu.vector_store %arg8[%c0_17, %c0_18], %23 {strides = array<i32>} : memref<8x8xf32, #tpu.memory_space<vmem>>, vector<8x8xf32>,
    return
  }
  func.func @transform_0(%arg0: i32) -> (i32, i32) {
    %c0_i32 = arith.constant 0 : i32
    %c0_i32_0 = arith.constant 0 : i32
    return %arg0, %c0_i32 : i32, i32
  }
  func.func @transform_1(%arg0: i32) -> (i32, i32) {
    %c0_i32 = arith.constant 0 : i32
    %c0_i32_0 = arith.constant 0 : i32
    %c0_i32_1 = arith.constant 0 : i32
    return %c0_i32, %c0_i32_0 : i32, i32
  }
  func.func @transform_2(%arg0: i32) -> (i32, i32) {
    %c0_i32 = arith.constant 0 : i32
    %c0_i32_0 = arith.constant 0 : i32
    %c0_i32_1 = arith.constant 0 : i32
    return %c0_i32, %c0_i32_0 : i32, i32
  }
  func.func @transform_3(%arg0: i32) -> (i32, i32) {
    %c0_i32 = arith.constant 0 : i32
    %c0_i32_0 = arith.constant 0 : i32
    %c0_i32_1 = arith.constant 0 : i32
    return %c0_i32, %c0_i32_0 : i32, i32
  }
  func.func @transform_4(%arg0: i32) -> (i32, i32) {
    %c0_i32 = arith.constant 0 : i32
    %c0_i32_0 = arith.constant 0 : i32
    %c0_i32_1 = arith.constant 0 : i32
    return %c0_i32, %c0_i32_0 : i32, i32
  }
  func.func @transform_5(%arg0: i32) -> (i32, i32) {
    %c0_i32 = arith.constant 0 : i32
    %c0_i32_0 = arith.constant 0 : i32
    %c0_i32_1 = arith.constant 0 : i32
    return %c0_i32, %c0_i32_0 : i32, i32
  }
  func.func @transform_6(%arg0: i32) -> (i32, i32) {
    %c0_i32 = arith.constant 0 : i32
    %c0_i32_0 = arith.constant 0 : i32
    %c0_i32_1 = arith.constant 0 : i32
    return %c0_i32, %c0_i32_0 : i32, i32
  }
  func.func @transform_7(%arg0: i32) -> (i32, i32) {
    %c0_i32 = arith.constant 0 : i32
    %c0_i32_0 = arith.constant 0 : i32
    return %arg0, %c0_i32 : i32, i32
  }
}

</mosaic_0001>

<bundles_post_ra>
// kernel: _forward.1
= control target key start
LH: loop header
LB: loop body
LE: loop exit
PB: predicated region body
PF: predicated region fallthrough
CT: control target
= control target key end

     0   :  { %12 = vsyncpa [#allocation3], 0  ;;  %s949_s0 = inlined_call_operand.hbm [shape: f32[8,32], index: 0, kind: input, shape index: {}]   ;;  %s950_s1 = inlined_call_operand.hbm [shape: bf16[32,256], index: 1, kind: input, shape index: {}]   ;;  %s951_s2 = inlined_call_operand.vmem [shape: f32[1,256], index: 2, kind: input, shape index: {}]   ;;  %s952_s3 = inlined_call_operand.hbm [shape: bf16[256,256], index: 3, kind: input, shape index: {}]   ;;  %s953_s4 = inlined_call_operand.vmem [shape: f32[1,256], index: 4, kind: input, shape index: {}]   ;;  %s954_s5 = inlined_call_operand.hbm [shape: bf16[256,128], index: 5, kind: input, shape index: {}]   ;;  %s955_s6 = inlined_call_operand.vmem [shape: f32[1,128], index: 6, kind: input, shape index: {}]   ;;  %s956_s7 = inlined_call_operand.hbm [shape: f32[8,8], index: 7, kind: output, shape index: {}]  }
   0x1   :  { %13 = vsyncpa [#allocation6], 0 }
   0x2   :  { %14 = vsyncpa [#allocation9], 0 }
   0x3   :  { %15 = vsyncpa [#allocation4], 0  ;;  %s875_s24 = smov [#allocation5]  }
   0x4   :  { %s31_s25 = sshll.u32 %s875_s24, 4  ;;  %s32_s25 = int_to_ptr.vmem [resolvable:$true] %s31_s25 }
   0x5   :  { %s775_s26 = scalar_lea.vmem %s32_s25, 512  ;;  %p780_p1 = scmp.lt.s32.totalorder %s32_s25, %s32_s25 }
   0x6   :  { %p776_p0 = scmp.ne.s32.totalorder %s32_s25, %s775_s26  ;;  %p781_p2 = scmp.lt.s32.totalorder %s775_s26, %s775_s26 }
   0x8   :  { %p782_p3 = por %p781_p2, %p780_p1 }
   0xa   :  { %p783_p4 = pnand %p782_p3, %p776_p0 }
   0xc   :  { %786 = shalt.err (!%p783_p4)
}
   0xd   :  { %s876_s27 = smov 128   ;;  %s877_s28 = smov 8  }
   0xe   :  { %37 = dma.hbm_to_vmem [thread:$0]  %s950_s1, 512, %s32_s25, [#allocation6], %s876_s27, %s876_s27, %s877_s28  }
   0xf   :  { %s878_s8 = smov [#allocation2]   ;;  %s879_s10 = smov [#allocation7]  }
  0x10   :  { %s22_s9 = sshll.u32 %s878_s8, 4  ;;  %s45_s11 = sshll.u32 %s879_s10, 4  ;;  %s23_s9 = int_to_ptr.vmem [resolvable:$true] %s22_s9  ;;  %s46_s11 = int_to_ptr.vmem [resolvable:$true] %s45_s11 }
  0x11   :  { %s795_s12 = scalar_lea.vmem %s23_s9, 128  ;;  %p800_p6 = scmp.lt.s32.totalorder %s23_s9, %s23_s9 }
  0x12   :  { %p796_p5 = scmp.ne.s32.totalorder %s23_s9, %s795_s12  ;;  %p801_p7 = scmp.lt.s32.totalorder %s795_s12, %s795_s12 }
  0x14   :  { %p802_p8 = por %p801_p7, %p800_p6 }
  0x16   :  { %p803_p9 = pnand %p802_p8, %p796_p5 }
  0x18   :  { %806 = shalt.err (!%p803_p9)
}
  0x19   :  { %25 = dma.hbm_to_vmem [thread:$0]  %s949_s0, 128, %s23_s9, [#allocation3]  }
  0x1a   :  { %s815_s15 = scalar_lea.vmem %s46_s11, 4096  ;;  %p820_p11 = scmp.lt.s32.totalorder %s46_s11, %s46_s11 }
  0x1b   :  { %p816_p10 = scmp.ne.s32.totalorder %s46_s11, %s815_s15  ;;  %p821_p12 = scmp.lt.s32.totalorder %s815_s15, %s815_s15 }
  0x1d   :  { %p822_p13 = por %p821_p12, %p820_p11 }
  0x1f   :  { %p823_p0 = pnand %p822_p13, %p816_p10 }
  0x21   :  { %826 = shalt.err (!%p823_p0)
}
  0x22   :  { %51 = dma.hbm_to_vmem [thread:$0]  %s952_s3, 4096, %s46_s11, [#allocation6], %s876_s27, %s876_s27, %s877_s28  }
  0x23   :  { %s880_s17 = smov [#allocation8]  }
  0x24   :  { %s59_s18 = sshll.u32 %s880_s17, 4  ;;  %s60_s18 = int_to_ptr.vmem [resolvable:$true] %s59_s18 }
  0x25   :  { %s835_s19 = scalar_lea.vmem %s60_s18, 2048  ;;  %p840_p2 = scmp.lt.s32.totalorder %s60_s18, %s60_s18 }
  0x26   :  { %p836_p1 = scmp.ne.s32.totalorder %s60_s18, %s835_s19  ;;  %p841_p3 = scmp.lt.s32.totalorder %s835_s19, %s835_s19 }
  0x28   :  { %p842_p4 = por %p841_p3, %p840_p2 }
  0x2a   :  { %p843_p5 = pnand %p842_p4, %p836_p1 }
  0x2c   :  { %846 = shalt.err (!%p843_p5)
}
  0x2d   :  { %s881_s0 = smov 64   ;;  %s882_s20 = smov 4  }
  0x2e   :  { %65 = dma.hbm_to_vmem [thread:$0]  %s954_s5, 2048, %s60_s18, [#allocation9], %s881_s0, %s881_s0, %s882_s20  }
  0x2f   :  { %867 = dma.done.wait [#allocation3], 128  }
  0x30   :  { %868 = vsyncadd [#allocation3], 4294967168 }
  0x31   :  { %869 = dma.done.wait [#allocation6], 4608  }
  0x32   :  { %870 = vsyncadd [#allocation6], 4294962688 }
  0x33   :  { %871 = dma.done.wait [#allocation9], 2048  }
  0x34   :  { %872 = vsyncadd [#allocation9], 4294965248  ;;  %v883_v0 = vmov 0   ;;  %v697_v1 = vld [vmem:[#allocation5 + $0x14] ss:$8 sps:$4 sm:$0xff]   ;;  %vm119_vm0 = vcmask 261120   ;;  %v89_v51 = vlaneseq }
  0x35   :  { %155 = vmatprep.mubr.bf16.mxu0 %v883_v0  ;;  %v699_v2 = vld [vmem:[#allocation5 + $0x10] ss:$8 sps:$4 sm:$0xff]   ;;  %135 = vmatprep.subr.bf16.mxu0 %v697_v1  ;;  %v700_v3 = vld [vmem:[#allocation5 + $0x4] ss:$8 sps:$4 sm:$0xff]   ;;  %v702_v4 = vld [vmem:[#allocation5] ss:$8 sps:$4 sm:$0xff]  }
  0x36   :  { %v81_v5 = vld [vmem:[#allocation2] sm:$0xff]  ;;  %136 = vmatpush1.bf16.msra.mxu0 %v699_v2  ;;  %v706_v8 = vld [vmem:[#allocation7 + $0x64] ss:$8 sps:$4 sm:$0xff]   ;;  %v708_v10 = vld [vmem:[#allocation7 + $0x60] ss:$8 sps:$4 sm:$0xff]   ;;  %v90_v52 = vshrl.u32 %v89_v51, 7 }
  0x37   :  { %v703_v6 = vld [vmem:[#allocation7 + $0x74] ss:$8 sps:$4 sm:$0xff]   ;;  %137 = vmatprep.subr.bf16.mxu0 %v700_v3  ;;  %v705_v7 = vld [vmem:[#allocation7 + $0x70] ss:$8 sps:$4 sm:$0xff]   ;;  %v82_v9 = vpack.c.bf16 %v81_v5, %v81_v5  ;;  %v712_v13 = vld [vmem:[#allocation7 + $0x44] ss:$8 sps:$4 sm:$0xff]  }
  0x38   :  { %372 = vmatprep.subr.bf16.mxu1 %v703_v6  ;;  %v709_v11 = vld [vmem:[#allocation7 + $0x54] ss:$8 sps:$4 sm:$0xff]   ;;  %v711_v12 = vld [vmem:[#allocation7 + $0x50] ss:$8 sps:$4 sm:$0xff]   ;;  %v714_v14 = vld [vmem:[#allocation7 + $0x40] ss:$8 sps:$4 sm:$0xff]  }
  0x39   :  { %373 = vmatpush1.bf16.msra.mxu1 %v705_v7  ;;  %v715_v15 = vld [vmem:[#allocation7 + $0x34] ss:$8 sps:$4 sm:$0xff]   ;;  %v717_v16 = vld [vmem:[#allocation7 + $0x30] ss:$8 sps:$4 sm:$0xff]   ;;  %v718_v17 = vld [vmem:[#allocation7 + $0x24] ss:$8 sps:$4 sm:$0xff]  }
  0x3a   :  { %138 = vmatpush1.bf16.msra.mxu0 %v702_v4  ;;  %374 = vmatprep.subr.bf16.mxu1 %v706_v8  ;;  %v720_v18 = vld [vmem:[#allocation7 + $0x20] ss:$8 sps:$4 sm:$0xff]   ;;  %v721_v19 = vld [vmem:[#allocation7 + $0x14] ss:$8 sps:$4 sm:$0xff]   ;;  %v723_v20 = vld [vmem:[#allocation7 + $0x10] ss:$8 sps:$4 sm:$0xff]  }
  0x3b   :  { %v724_v21 = vld [vmem:[#allocation7 + $0x4] ss:$8 sps:$4 sm:$0xff]   ;;  %v726_v22 = vld [vmem:[#allocation7] ss:$8 sps:$4 sm:$0xff]   ;;  %v727_v23 = vld [vmem:[#allocation7 + $0xf4] ss:$8 sps:$4 sm:$0xff]  }
  0x3c   :  { %v729_v24 = vld [vmem:[#allocation7 + $0xf0] ss:$8 sps:$4 sm:$0xff]   ;;  %v730_v25 = vld [vmem:[#allocation7 + $0xe4] ss:$8 sps:$4 sm:$0xff]   ;;  %v732_v26 = vld [vmem:[#allocation7 + $0xe0] ss:$8 sps:$4 sm:$0xff]  }
  0x3d   :  { %615 = vmatmul.mubr.msk.bf16.vlgmr.msra.gmra.mxu0 %vm119_vm0, %v82_v9  ;;  %375 = vmatpush1.bf16.msra.mxu1 %v708_v10  ;;  %v733_v27 = vld [vmem:[#allocation7 + $0xd4] ss:$8 sps:$4 sm:$0xff]   ;;  %v735_v28 = vld [vmem:[#allocation7 + $0xd0] ss:$8 sps:$4 sm:$0xff]   ;;  %v736_v29 = vld [vmem:[#allocation7 + $0xc4] ss:$8 sps:$4 sm:$0xff]  }
  0x3e   :  { %376 = vmatprep.subr.bf16.mxu1 %v709_v11  ;;  %v738_v30 = vld [vmem:[#allocation7 + $0xc0] ss:$8 sps:$4 sm:$0xff]   ;;  %v739_v31 = vld [vmem:[#allocation7 + $0xb4] ss:$8 sps:$4 sm:$0xff]   ;;  %v741_v32 = vld [vmem:[#allocation7 + $0xb0] ss:$8 sps:$4 sm:$0xff]  }
  0x3f   :  { %v742_v33 = vld [vmem:[#allocation7 + $0xa4] ss:$8 sps:$4 sm:$0xff]   ;;  %v744_v34 = vld [vmem:[#allocation7 + $0xa0] ss:$8 sps:$4 sm:$0xff]   ;;  %v745_v35 = vld [vmem:[#allocation7 + $0x94] ss:$8 sps:$4 sm:$0xff]  }
  0x40   :  { %v747_v36 = vld [vmem:[#allocation7 + $0x90] ss:$8 sps:$4 sm:$0xff]   ;;  %v748_v37 = vld [vmem:[#allocation7 + $0x84] ss:$8 sps:$4 sm:$0xff]   ;;  %v750_v38 = vld [vmem:[#allocation7 + $0x80] ss:$8 sps:$4 sm:$0xff]  }
  0x41   :  { %377 = vmatpush1.bf16.msra.mxu1 %v711_v12  ;;  %v751_v39 = vld [vmem:[#allocation8 + $0x78] sm:$0xff]   ;;  %v753_v41 = vld [vmem:[#allocation8 + $0x70] sm:$0xff]   ;;  %v755_v43 = vld [vmem:[#allocation8 + $0x68] sm:$0xff]   ;;  %v91_v53 = vsub.s32 0, %v90_v52  ;;  %v95_v55 = vsub.s32 1, %v90_v52  ;;  %vm592_vm1 = vcmask 64512  }
  0x42   :  { %378 = vmatprep.subr.bf16.mxu1 %v712_v13  ;;  %v752_v40 = vld [vmem:[#allocation8 + $0x38] sm:$0xff]   ;;  %665 = vmatprep.subr.bf16.mxu0 %v751_v39  ;;  %v754_v42 = vld [vmem:[#allocation8 + $0x30] sm:$0xff]   ;;  %v756_v44 = vld [vmem:[#allocation8 + $0x28] sm:$0xff]  }
  0x43   :  { %666 = vmatpush3.bf16.msra.mxu0 %v752_v40  ;;  %v757_v45 = vld [vmem:[#allocation8 + $0x60] sm:$0xff]   ;;  %v759_v47 = vld [vmem:[#allocation8 + $0x58] sm:$0xff]   ;;  %v761_v49 = vld [vmem:[#allocation8 + $0x50] sm:$0xff]  }
  0x44   :  { %667 = vmatprep.subr.bf16.mxu0 %v753_v41  ;;  %v758_v46 = vld [vmem:[#allocation8 + $0x20] sm:$0xff]   ;;  %v760_v48 = vld [vmem:[#allocation8 + $0x18] sm:$0xff]   ;;  %v762_v50 = vld [vmem:[#allocation8 + $0x10] sm:$0xff]  }
  0x45   :  { %379 = vmatpush1.bf16.msra.mxu1 %v714_v14  ;;  %v87_v54 = vld [vmem:[%s951_s2] sm:$0x3]  ;;  %v763_v4 = vld [vmem:[#allocation8 + $0x48] sm:$0xff]   ;;  %v765_v6 = vld [vmem:[#allocation8 + $0x40] sm:$0xff]  }
  0x46   :  { %380 = vmatprep.subr.bf16.mxu1 %v715_v15  ;;  %v92_v56 = vrot.slane %v87_v54, %v91_v53  ;;  %v96_v57 = vrot.slane %v87_v54, %v95_v55  ;;  %v764_v5 = vld [vmem:[#allocation8 + $0x8] sm:$0xff]   ;;  %v766_v7 = vld [vmem:[#allocation8] sm:$0xff]   ;;  %v200_v8 = vld [vmem:[%s953_s4] sm:$0x3]  ;;  %s884_s4 = smov [#allocation10]  }
  0x47   :  { %668 = vmatpush3.bf16.msra.mxu0 %v754_v42  ;;  %v205_v9 = vrot.slane %v200_v8, %v91_v53  ;;  %v209_v10 = vrot.slane %v200_v8, %v95_v55  ;;  %s600_s26 = sshll.u32 %s884_s4, 4  ;;  %s601_s26 = int_to_ptr.vmem [resolvable:$true] %s600_s26 }
  0x48   :  { %669 = vmatprep.subr.bf16.mxu0 %v755_v43  ;;  %s847_s27 = scalar_lea.vmem %s601_s26, 128  ;;  %p852_p7 = scmp.lt.s32.totalorder %s601_s26, %s601_s26 }
  0x49   :  { %381 = vmatpush1.bf16.msra.mxu1 %v717_v16  ;;  %p848_p6 = scmp.ne.s32.totalorder %s601_s26, %s847_s27  ;;  %p853_p8 = scmp.lt.s32.totalorder %s847_s27, %s847_s27 }
  0x4a   :  { %382 = vmatprep.subr.bf16.mxu1 %v718_v17 }
  0x4b   :  { %670 = vmatpush3.bf16.msra.mxu0 %v756_v44  ;;  %p854_p9 = por %p853_p8, %p852_p7 }
  0x4c   :  { %671 = vmatprep.subr.bf16.mxu0 %v757_v45 }
  0x4d   :  { %383 = vmatpush1.bf16.msra.mxu1 %v720_v18  ;;  %p855_p10 = pnand %p854_p9, %p848_p6 }
  0x4e   :  { %384 = vmatprep.subr.bf16.mxu1 %v721_v19 }
  0x4f   :  { %672 = vmatpush3.bf16.msra.mxu0 %v758_v46 }
  0x50   :  { %673 = vmatprep.subr.bf16.mxu0 %v759_v47 }
  0x51   :  { %385 = vmatpush1.bf16.msra.mxu1 %v723_v20 }
  0x52   :  { %386 = vmatprep.subr.bf16.mxu1 %v724_v21 }
  0x53   :  { %674 = vmatpush3.bf16.msra.mxu0 %v760_v48 }
  0x54   :  { %675 = vmatprep.subr.bf16.mxu0 %v761_v49 }
  0x55   :  { %387 = vmatpush1.bf16.msra.mxu1 %v726_v22  ;;  %v648_v22 = vld [vmem:[%s955_s6] ss:$0 sm:$0xff] }
  0x56   :  { %388 = vmatprep.subr.bf16.mxu1 %v727_v23 }
  0x57   :  { %676 = vmatpush3.bf16.msra.mxu0 %v762_v50 }
  0x58   :  { %677 = vmatprep.subr.bf16.mxu0 %v763_v4 }
  0x59   :  { %389 = vmatpush2.bf16.msra.mxu1 %v729_v24 }
  0x5a   :  { %390 = vmatprep.subr.bf16.mxu1 %v730_v25 }
  0x5b   :  { %678 = vmatpush3.bf16.msra.mxu0 %v764_v5 }
  0x5c   :  { %679 = vmatprep.subr.bf16.mxu0 %v765_v6 }
  0x5d   :  { %391 = vmatpush2.bf16.msra.mxu1 %v732_v26 }
  0x5e   :  { %392 = vmatprep.subr.bf16.mxu1 %v733_v27 }
  0x5f   :  { %680 = vmatpush3.bf16.msra.mxu0 %v766_v7 }
  0x61   :  { %393 = vmatpush2.bf16.msra.mxu1 %v735_v28 }
  0x62   :  { %394 = vmatprep.subr.bf16.mxu1 %v736_v29 }
  0x65   :  { %395 = vmatpush2.bf16.msra.mxu1 %v738_v30 }
  0x66   :  { %396 = vmatprep.subr.bf16.mxu1 %v739_v31 }
  0x69   :  { %397 = vmatpush2.bf16.msra.mxu1 %v741_v32 }
  0x6a   :  { %398 = vmatprep.subr.bf16.mxu1 %v742_v33 }
  0x6d   :  { %399 = vmatpush2.bf16.msra.mxu1 %v744_v34 }
  0x6e   :  { %400 = vmatprep.subr.bf16.mxu1 %v745_v35 }
  0x71   :  { %401 = vmatpush2.bf16.msra.mxu1 %v747_v36 }
  0x72   :  { %402 = vmatprep.subr.bf16.mxu1 %v748_v37 }
  0x75   :  { %403 = vmatpush2.bf16.msra.mxu1 %v750_v38 }
  0xfd   :  { %v157_v58 = vpop.f32.mrf.mxu0 }
  0xfe   :  { %v158_v59 = vadd.f32 %v157_v58, %v92_v56 }
  0xff   :  { %v159_v60 = vpop.f32.mrf.mxu0 }
 0x100   :  { %v160_v61 = vadd.f32 %v159_v60, %v96_v57  ;;  %v164_v62 = vmax.f32 %v158_v59, 0.0 }
 0x101   :  { %v161_v63 = vpop.f32.mrf.mxu0 }
 0x102   :  { %v165_v0 = vmax.f32 %v160_v61, 0.0  ;;  %v166_v3 = vpack.c.bf16 %v164_v62, %v164_v62 }
 0x103   :  { %v162_v1 = vpop.f32.mrf.mxu0 }
 0x104   :  { %v167_v2 = vpack.c.bf16 %v165_v0, %v165_v0 }
 0x106   :  { %404 = vmatprep.mubr.bf16.mxu1 %v167_v2 }
 0x107   :  { %405 = vmatmul.mubr.bf16.vlgmr.msra.gmra.mxu1 %v166_v3 }
 0x1c7   :  { %v406_v11 = vpop.f32.mrf.mxu1 }
 0x1c8   :  { %v407_v12 = vadd.f32 %v406_v11, %v205_v9 }
 0x1c9   :  { %v408_v13 = vpop.f32.mrf.mxu1 }
 0x1ca   :  { %v409_v14 = vadd.f32 %v408_v13, %v209_v10  ;;  %v413_v15 = vmax.f32 %v407_v12, 0.0 }
 0x1cb   :  { %v410_v16 = vpop.f32.mrf.mxu1 }
 0x1cc   :  { %v414_v17 = vmax.f32 %v409_v14, 0.0  ;;  %v415_v20 = vpack.c.bf16 %v413_v15, %v413_v15 }
 0x1cd   :  { %v411_v18 = vpop.f32.mrf.mxu1 }
 0x1ce   :  { %v416_v19 = vpack.c.bf16 %v414_v17, %v414_v17 }
 0x1d0   :  { %584 = vmatprep.mubr.bf16.mxu0 %v416_v19 }
 0x1d1   :  { %585 = vmatmul.mubr.bf16.vlgmr.msra.gmra.mxu0 %v415_v20 }
 0x291   :  { %v681_v21 = vpop.f32.mrf.mxu0 }
 0x293   :  { %v682_v23 = vpop.f32.mrf.mxu0 }
 0x294   :  { %v683_v24 = vadd.f32 %v682_v23, %v681_v21 }
 0x295   :  { %v684_v25 = vpop.f32.mrf.mxu0 }
 0x296   :  { %v587_v26 = vadd.f32 %v683_v24, %v648_v22 }
 0x297   :  { %v685_v27 = vpop.f32.mrf.mxu0 }
 0x298   :  { %593 = vst.msk [vmem:[#allocation10] sm:$0xff] %vm592_vm1, %v587_v26 }
 0x299   :  { %858 = shalt.err (!%p855_p10)
}
 0x29a   :  { %603 = dma.vmem_to_hbm [thread:$0]  %s601_s26, 128, %s956_s7, [#allocation4]  }
 0x29b   :  { %873 = dma.done.wait [#allocation4], 128  }
 0x29c   :  { %874 = vsyncadd [#allocation4], 4294967168 }
 0x29d   :  { %607 = vsyncpa [#allocation3], 1 }
 0x29e   :  { %608 = vsyncpa [#allocation6], 1 }
 0x29f   :  { %609 = vsyncpa [#allocation9], 1 }
 0x2a0   :  { %610 = vsyncpa [#allocation4], 1 }

</bundles_post_ra>
